<compile_context>
chip_gen: v7x
topology: tpu7x:2x2x1
jax: 0.10.0
libtpu: 0.0.40
codegen_flags: <defaults>
</compile_context>

<pallas_src>
from functools import partial
from typing import NamedTuple

import jax
import jax.numpy as jnp
from jax.experimental import pallas as pl
from jax.experimental.pallas import tpu as pltpu


def _round_up(v, m):
    return (v + m - 1) // m * m


def _pick_tile_b(batch):
    # Prefer big tiles (better HBM-roofline fraction, fewer per-step overheads)
    # once the batch yields enough grid steps to keep the pipeline and both
    # v7x TensorCores busy; otherwise keep 128-row tiles so grid >= 2 when
    # batch >= 256 (megacore) and never exceed the (padded) batch.
    for t in (1024, 512, 256):
        if batch >= 8 * t:
            return t
    return 128


def mlp_kernel(x_ref, w1_ref, b1_ref, w2_ref, b2_ref, o_ref):
    # x_ref:  [TILE_B, In]  bf16   (In = real input width, not padded)
    # w1_ref: [In, Hp]      bf16   (resident across grid steps)
    # b1_ref: [1, Hp]       f32
    # w2_ref: [Hp, Cp]      bf16   (resident)
    # b2_ref: [1, Cp]       f32
    # o_ref:  [TILE_B, Cp]  bf16/f32
    x = x_ref[...]
    # First matmul on the MXU, f32 accumulate.
    h = jnp.dot(x, w1_ref[...], preferred_element_type=jnp.float32)
    # Bias add + ReLU in f32 on the VPU (v5e has no bf16 VPU).
    h = jnp.maximum(h + b1_ref[...], 0.0)
    # Cast only the MXU operand to bf16 for the second matmul.
    h = h.astype(jnp.bfloat16)
    # TODO(synk): for large H, chunk the hidden dim here (512-col slabs of
    # w1/w2 with a running y accumulator) instead of materializing the full
    # [TILE_B, Hp] f32 intermediate; likewise add a K-reduction grid axis if
    # the resident weights outgrow v7x's 64 MiB VMEM.
    y = jnp.dot(h, w2_ref[...], preferred_element_type=jnp.float32)
    y = y + b2_ref[...]
    o_ref[...] = y.astype(o_ref.dtype)


class MLPParams(NamedTuple):
    w1: jax.Array  # [In, Hp] bf16
    b1: jax.Array  # [1, Hp]  f32
    w2: jax.Array  # [Hp, Cp] bf16
    b2: jax.Array  # [1, Cp]  f32
    num_classes: int  # real (unpadded) C


def prepare_params(w1, b1, w2, b2):
    """One-time padding / casting of the MLP parameters (hoisted out of the
    per-call forward). Expects w1: [In, H], b1: [1, H] or [H], w2: [H, C],
    b2: [1, C] or [C] (i.e. nn.Linear weights already transposed to [in, out]).
    Zero padding of H / C is mathematically exact."""
    In, H = w1.shape
    C = w2.shape[1]
    Hp = _round_up(H, 128)
    Cp = _round_up(C, 128)

    w1p = jnp.zeros((In, Hp), jnp.bfloat16).at[:, :H].set(w1.astype(jnp.bfloat16))
    b1p = jnp.zeros((1, Hp), jnp.float32).at[:, :H].set(
        jnp.reshape(b1, (1, -1)).astype(jnp.float32))
    w2p = jnp.zeros((Hp, Cp), jnp.bfloat16).at[:H, :C].set(w2.astype(jnp.bfloat16))
    b2p = jnp.zeros((1, Cp), jnp.float32).at[:, :C].set(
        jnp.reshape(b2, (1, -1)).astype(jnp.float32))
    return MLPParams(w1p, b1p, w2p, b2p, int(C))


@partial(jax.jit, static_argnames=("tile_b", "num_classes", "out_dtype"))
def _mlp_forward_impl(x, w1p, b1p, w2p, b2p, *, tile_b, num_classes, out_dtype):
    B, In = x.shape
    Hp = w1p.shape[1]
    Cp = w2p.shape[1]
    Bp = _round_up(B, tile_b)

    # Only the activations are touched per call; cast + (rare) batch pad fuse
    # under jit. The contraction dim In is deliberately left unpadded.
    xb = x.astype(jnp.bfloat16)
    if Bp != B:
        xb = jnp.pad(xb, ((0, Bp - B), (0, 0)))

    grid = (Bp // tile_b,)

    out = pl.pallas_call(
        mlp_kernel,
        out_shape=jax.ShapeDtypeStruct((Bp, Cp), out_dtype),
        grid_spec=pl.GridSpec(
            grid=grid,
            in_specs=[
                # Activations: one batch tile per grid step (software-pipelined).
                # Block last dim == full array dim, so In need not be 128-aligned.
                pl.BlockSpec((tile_b, In), lambda i: (i, 0)),
                # Weights / biases: constant block index -> VMEM-resident.
                pl.BlockSpec((In, Hp), lambda i: (0, 0)),
                pl.BlockSpec((1, Hp), lambda i: (0, 0)),
                pl.BlockSpec((Hp, Cp), lambda i: (0, 0)),
                pl.BlockSpec((1, Cp), lambda i: (0, 0)),
            ],
            out_specs=pl.BlockSpec((tile_b, Cp), lambda i: (i, 0)),
        ),
        compiler_params=pltpu.CompilerParams(
            # Independent batch tiles: shard across TensorCores on multi-TC chips.
            dimension_semantics=("parallel",),
            # Above v5e's 16 MiB scoped default, well under every generation's
            # physical VMEM (64 MiB on v7x). Resident bf16 weights + the
            # double-buffered x / output tiles + the f32 hidden intermediate
            # fit with large margin at these shapes; raise (v5e/v6e) or add a
            # reduction grid axis (v7x) when H / C grow into the tens of MiB.
            vmem_limit_bytes=32 * 1024 * 1024,
        ),
    )(xb, w1p, b1p, w2p, b2p)

    return out[:B, :num_classes]


def mlp_forward(x, params: MLPParams, *, out_dtype=jnp.bfloat16):
    """x: [B, In] (any float dtype) -> [B, num_classes] in `out_dtype`."""
    tile_b = _pick_tile_b(x.shape[0])
    return _mlp_forward_impl(
        x, params.w1, params.b1, params.w2, params.b2,
        tile_b=tile_b, num_classes=params.num_classes, out_dtype=out_dtype)


if __name__ == "__main__":
    # Small shapes consistent with the module's forward: [batch, input_size].
    batch, input_size, hidden_size, num_classes = 256, 32, 64, 10

    key = jax.random.PRNGKey(0)
    kx, kw1, kb1, kw2, kb2 = jax.random.split(key, 5)

    # Deterministic parameter init (mimics nn.Linear uniform(-1/sqrt(in), 1/sqrt(in))),
    # stored pre-transposed as [in, out].
    bound1 = 1.0 / jnp.sqrt(input_size)
    bound2 = 1.0 / jnp.sqrt(hidden_size)
    x = jax.random.normal(kx, (batch, input_size), dtype=jnp.float32)
    w1 = jax.random.uniform(kw1, (input_size, hidden_size), jnp.float32, -bound1, bound1)
    b1 = jax.random.uniform(kb1, (1, hidden_size), jnp.float32, -bound1, bound1)
    w2 = jax.random.uniform(kw2, (hidden_size, num_classes), jnp.float32, -bound2, bound2)
    b2 = jax.random.uniform(kb2, (1, num_classes), jnp.float32, -bound2, bound2)

    # One-time parameter prep (padding / bf16 cast hoisted out of the forward).
    params = prepare_params(w1, b1, w2, b2)
    jax.block_until_ready(params)

    out = mlp_forward(x, params)  # bf16 output by default (smallest HBM stream)
    jax.block_until_ready(out)

    # Reference check in plain JAX (f32). bf16 matmul operands + bf16 output
    # => wider tolerance than pure f32.
    ref = jnp.maximum(x @ w1 + b1, 0.0) @ w2 + b2
    assert out.shape == (batch, num_classes)
    assert out.dtype == jnp.bfloat16
    err = float(jnp.max(jnp.abs(out.astype(jnp.float32) - ref)))
    assert jnp.allclose(out.astype(jnp.float32), ref, atol=3e-2, rtol=3e-2), err

    print("KERNEL_OK")
</pallas_src>

<mosaic_0001>
module attributes {stable_mosaic.version = 11 : i64} {
  func.func @mlp_kernel(%arg0: i32, %arg1: memref<128x32xbf16, #tpu.memory_space<vmem>>, %arg2: memref<32x128xbf16, #tpu.memory_space<vmem>>, %arg3: memref<1x128xf32, #tpu.memory_space<vmem>>, %arg4: memref<128x128xbf16, #tpu.memory_space<vmem>>, %arg5: memref<1x128xf32, #tpu.memory_space<vmem>>, %arg6: memref<128x128xbf16, #tpu.memory_space<vmem>>) attributes {dimension_semantics = [#tpu.dimension_semantics<parallel>], iteration_bounds = array<i64: 2>, scalar_prefetch = 0 : i64, scratch_operands = 0 : i64, tpu.core_type = #tpu.core_type<tc>, window_params = [{transform_indices = @transform_0, window_bounds = array<i64: 128, 32>}, {pipeline_mode = #tpu.pipeline_mode<synchronous>, transform_indices = @transform_1, window_bounds = array<i64: 32, 128>}, {pipeline_mode = #tpu.pipeline_mode<synchronous>, transform_indices = @transform_2, window_bounds = array<i64: 1, 128>}, {pipeline_mode = #tpu.pipeline_mode<synchronous>, transform_indices = @transform_3, window_bounds = array<i64: 128, 128>}, {pipeline_mode = #tpu.pipeline_mode<synchronous>, transform_indices = @transform_4, window_bounds = array<i64: 1, 128>}, {transform_indices = @transform_5, window_bounds = array<i64: 128, 128>}]} {
    %c0 = arith.constant 0 : index
    %c0_0 = arith.constant 0 : index
    %0 = vector.load %arg1[%c0, %c0_0] : memref<128x32xbf16, #tpu.memory_space<vmem>>, vector<128x32xbf16>
    %c0_1 = arith.constant 0 : index
    %c0_2 = arith.constant 0 : index
    %1 = vector.load %arg2[%c0_1, %c0_2] : memref<32x128xbf16, #tpu.memory_space<vmem>>, vector<32x128xbf16>
    %cst = arith.constant dense<0.000000e+00> : vector<128x128xf32>
    %2 = tpu.matmul %0, %1, %cst {dimension_numbers = #tpu.dot_dimension_numbers<[1], [0], [0], [1], [0, 0, 1, 1], [], []>} : vector<128x32xbf16>, vector<32x128xbf16>, vector<128x128xf32> -> vector<128x128xf32>
    %c0_3 = arith.constant 0 : index
    %c0_4 = arith.constant 0 : index
    %3 = vector.load %arg3[%c0_3, %c0_4] : memref<1x128xf32, #tpu.memory_space<vmem>>, vector<1x128xf32>
    %4 = vector.broadcast %3 : vector<1x128xf32> to vector<128x128xf32>
    %5 = arith.addf %2, %4 : vector<128x128xf32>
    %cst_5 = arith.constant 0.000000e+00 : f32
    %6 = vector.broadcast %cst_5 : f32 to vector<128x128xf32>
    %7 = arith.maximumf %5, %6 : vector<128x128xf32>
    %8 = arith.truncf %7 : vector<128x128xf32> to vector<128x128xbf16>
    %c0_6 = arith.constant 0 : index
    %c0_7 = arith.constant 0 : index
    %9 = vector.load %arg4[%c0_6, %c0_7] : memref<128x128xbf16, #tpu.memory_space<vmem>>, vector<128x128xbf16>
    %cst_8 = arith.constant dense<0.000000e+00> : vector<128x128xf32>
    %10 = tpu.matmul %8, %9, %cst_8 {dimension_numbers = #tpu.dot_dimension_numbers<[1], [0], [0], [1], [0, 0, 1, 1], [], []>} : vector<128x128xbf16>, vector<128x128xbf16>, vector<128x128xf32> -> vector<128x128xf32>
    %c0_9 = arith.constant 0 : index
    %c0_10 = arith.constant 0 : index
    %11 = vector.load %arg5[%c0_9, %c0_10] : memref<1x128xf32, #tpu.memory_space<vmem>>, vector<1x128xf32>
    %12 = vector.broadcast %11 : vector<1x128xf32> to vector<128x128xf32>
    %13 = arith.addf %10, %12 : vector<128x128xf32>
    %14 = arith.truncf %13 : vector<128x128xf32> to vector<128x128xbf16>
    %c0_11 = arith.constant 0 : index
    %c0_12 = arith.constant 0 : index
    %15 = vector.load %arg6[%c0_11, %c0_12] : memref<128x128xbf16, #tpu.memory_space<vmem>>, vector<128x128xbf16>
    tpu.vector_store %arg6[%c0_11, %c0_12], %14 {strides = array<i32>} : memref<128x128xbf16, #tpu.memory_space<vmem>>, vector<128x128xbf16>,
    return
  }
  func.func @transform_0(%arg0: i32) -> (i32, i32) {
    %c0_i32 = arith.constant 0 : i32
    %c0_i32_0 = arith.constant 0 : i32
    return %arg0, %c0_i32 : i32, i32
  }
  func.func @transform_1(%arg0: i32) -> (i32, i32) {
    %c0_i32 = arith.constant 0 : i32
    %c0_i32_0 = arith.constant 0 : i32
    %c0_i32_1 = arith.constant 0 : i32
    return %c0_i32, %c0_i32_0 : i32, i32
  }
  func.func @transform_2(%arg0: i32) -> (i32, i32) {
    %c0_i32 = arith.constant 0 : i32
    %c0_i32_0 = arith.constant 0 : i32
    %c0_i32_1 = arith.constant 0 : i32
    return %c0_i32, %c0_i32_0 : i32, i32
  }
  func.func @transform_3(%arg0: i32) -> (i32, i32) {
    %c0_i32 = arith.constant 0 : i32
    %c0_i32_0 = arith.constant 0 : i32
    %c0_i32_1 = arith.constant 0 : i32
    return %c0_i32, %c0_i32_0 : i32, i32
  }
  func.func @transform_4(%arg0: i32) -> (i32, i32) {
    %c0_i32 = arith.constant 0 : i32
    %c0_i32_0 = arith.constant 0 : i32
    %c0_i32_1 = arith.constant 0 : i32
    return %c0_i32, %c0_i32_0 : i32, i32
  }
  func.func @transform_5(%arg0: i32) -> (i32, i32) {
    %c0_i32 = arith.constant 0 : i32
    %c0_i32_0 = arith.constant 0 : i32
    return %arg0, %c0_i32 : i32, i32
  }
}

</mosaic_0001>

<bundles_post_ra>
// kernel: _mlp_forward_impl.1
= control target key start
LH: loop header
LB: loop body
LE: loop exit
PB: predicated region body
PF: predicated region fallthrough
CT: control target
= control target key end

     0   :  { %s1034_s18 = smov 0   ;;  %s1122_s0 = inlined_call_operand.vmem [shape: bf16[256,32], index: 0, kind: input, shape index: {}]   ;;  %s1123_s1 = inlined_call_operand.vmem [shape: bf16[32,128], index: 1, kind: input, shape index: {}]   ;;  %s1124_s2 = inlined_call_operand.vmem [shape: f32[1,128], index: 2, kind: input, shape index: {}]   ;;  %s1125_s3 = inlined_call_operand.vmem [shape: bf16[128,128], index: 3, kind: input, shape index: {}]   ;;  %s1126_s4 = inlined_call_operand.vmem [shape: f32[1,128], index: 4, kind: input, shape index: {}]   ;;  %s1127_s5 = inlined_call_operand.vmem [shape: bf16[256,128], index: 5, kind: output, shape index: {}]  }
   0x1 LB: > { %s758_s19 = sadd.s32 4294967295, %s1002_s18   ;;  %p762_p0 = scmp.ge.s32.totalorder %s1002_s18, 1  ;;  %s1002_s18 = sphi %s1034_s18, %s15_s18  }
   0x2   : > { %p188_p1 = scmp.lt.s32.totalorder %s1002_s18, 3 }
   0x4   : > { %p189_p2 = pnand %p762_p0, %p188_p1 }
   0x5   : > { %v978_v0 = vld [vmem:[%s1123_s1] sm:$0xff] (!%p189_p2)   ;;  %s763_s22 = sshll.u32 (!%p189_p2), %s758_s19, 4  ;;  %v979_v1 = vld [vmem:[%s1123_s1 + $0x8] sm:$0xff] (!%p189_p2)   ;;  %vm308_vm0 = vcmask (!%p189_p2), 261120   ;;  %v990_v4 = vld [vmem:[%s1125_s3 + $0x10] sm:$0xff] (!%p189_p2)  }
   0x6   : > { %192 = sbr.rel (%p189_p2) target bundleno = 484 (0x1e4), region = 40  ;;  %p217_p3 = scmp.lt.s32.totalorder (!%p189_p2), %s763_s22, 31  ;;  %902 = vmatprep.subr.bf16.mxu0 (!%p189_p2), %v978_v0  ;;  %v988_v2 = vld [vmem:[%s1125_s3] sm:$0xff] (!%p189_p2)   ;;  %v989_v3 = vld [vmem:[%s1125_s3 + $0x8] sm:$0xff] (!%p189_p2)   ;;  %v991_v8 = vld [vmem:[%s1125_s3 + $0x18] sm:$0xff] (!%p189_p2)  }
   0x7   : > { %903 = vmatpush3.bf16.msra.mxu0 (!%p189_p2), %v978_v0  ;;  %954 = vmatprep.subr.bf16.mxu1 (!%p189_p2), %v988_v2  ;;  %v992_v10 = vld [vmem:[%s1125_s3 + $0x20] sm:$0xff] (!%p189_p2)   ;;  %v993_v12 = vld [vmem:[%s1125_s3 + $0x28] sm:$0xff] (!%p189_p2)   ;;  %v994_v16 = vld [vmem:[%s1125_s3 + $0x30] sm:$0xff] (!%p189_p2)  }
   0x8   : > { %904 = vmatprep.subr.bf16.mxu0 (!%p189_p2), %v979_v1  ;;  %962 = vmatpush3.bf16.msra.mxu1 (!%p189_p2), %v988_v2  ;;  %v995_v17 = vld [vmem:[%s1125_s3 + $0x38] sm:$0xff] (!%p189_p2)   ;;  %v767_v18 = vld [vmem:[%s1124_s2] ss:$0 sm:$0xff] (!%p189_p2) }
   0x9   : > { %955 = vmatprep.subr.bf16.mxu1 (!%p189_p2), %v989_v3 }
   0xb   : > { %905 = vmatpush3.bf16.msra.mxu0 (!%p189_p2), %v979_v1 }
   0xc   : > { %922 = vmatprep.subr.bf16.mxu0 (!%p189_p2), %v988_v2  ;;  %963 = vmatpush3.bf16.msra.mxu1 (!%p189_p2), %v989_v3 }
   0xd   : > { %s1129_s22 = smov (!%p217_p3, %s763_s22), 31  ;;  %956 = vmatprep.subr.bf16.mxu1 %v990_v4 }
   0xe   : > { %s764_s29 = sshll.u32 %s1129_s22, 2 }
   0xf   : > { %s1062_s7 = scalar_lea.vmem %s1122_s0, %s764_s29  ;;  %s1109_s28 = scalar_lea.vmem %s1127_s5, %s764_s29 }
  0x10   : > { %v980_v5 = vld [vmem:[%s1062_s7] sm:$0xff]   ;;  %v981_v6 = vld [vmem:[%s1062_s7 + $0x8] sm:$0xff]   ;;  %v982_v7 = vld [vmem:[%s1062_s7 + $0x10] sm:$0xff]   ;;  %964 = vmatpush3.bf16.msra.mxu1 %v990_v4 }
  0x11   : > { %906 = vmatprep.mubr.msk.bf16.mxu0 %vm308_vm0, %v980_v5  ;;  %v983_v9 = vld [vmem:[%s1062_s7 + $0x18] sm:$0xff]   ;;  %957 = vmatprep.subr.bf16.mxu1 %v991_v8  ;;  %v984_v11 = vld [vmem:[%s1062_s7 + $0x20] sm:$0xff]   ;;  %v985_v13 = vld [vmem:[%s1062_s7 + $0x28] sm:$0xff]  }
  0x12   : > { %907 = vmatmul.mubr.msk.bf16.vlgmr.msra.gmra.mrb[0].mxu0 %vm308_vm0, %v981_v6  ;;  %v986_v14 = vld [vmem:[%s1062_s7 + $0x30] sm:$0xff]   ;;  %v987_v15 = vld [vmem:[%s1062_s7 + $0x38] sm:$0xff]  }
  0x13   : > { %910 = vmatprep.mubr.msk.bf16.mxu0 %vm308_vm0, %v982_v7  ;;  %923 = vmatpush3.bf16.msra.mxu0 %v988_v2 }
  0x14   : > { %924 = vmatprep.subr.bf16.mxu0 %v989_v3  ;;  %965 = vmatpush3.bf16.msra.mxu1 %v991_v8 }
  0x15   : > { %958 = vmatprep.subr.bf16.mxu1 %v992_v10 }
  0x17   : > { %925 = vmatpush3.bf16.msra.mxu0 %v989_v3 }
  0x18   : > { %926 = vmatprep.subr.bf16.mxu0 %v990_v4  ;;  %966 = vmatpush3.bf16.msra.mxu1 %v992_v10 }
  0x19   : > { %959 = vmatprep.subr.bf16.mxu1 %v993_v12 }
  0x1a   : > { %911 = vmatmul.mubr.msk.bf16.gmra.mrb[4].mxu0 %vm308_vm0, %v983_v9 }
  0x1b   : > { %914 = vmatprep.mubr.msk.bf16.mxu0 %vm308_vm0, %v984_v11  ;;  %927 = vmatpush3.bf16.msra.mxu0 %v990_v4 }
  0x1c   : > { %928 = vmatprep.subr.bf16.mxu0 %v991_v8  ;;  %967 = vmatpush3.bf16.msra.mxu1 %v993_v12 }
  0x1d   : > { %960 = vmatprep.subr.bf16.mxu1 %v994_v16 }
  0x1f   : > { %929 = vmatpush3.bf16.msra.mxu0 %v991_v8 }
  0x20   : > { %930 = vmatprep.subr.bf16.mxu0 %v992_v10  ;;  %968 = vmatpush3.bf16.msra.mxu1 %v994_v16 }
  0x21   : > { %961 = vmatprep.subr.bf16.mxu1 %v995_v17 }
  0x22   : > { %915 = vmatmul.mubr.msk.bf16.gmra.mrb[8].mxu0 %vm308_vm0, %v985_v13 }
  0x23   : > { %918 = vmatprep.mubr.msk.bf16.mxu0 %vm308_vm0, %v986_v14  ;;  %931 = vmatpush3.bf16.msra.mxu0 %v992_v10 }
  0x24   : > { %932 = vmatprep.subr.bf16.mxu0 %v993_v12  ;;  %969 = vmatpush3.bf16.msra.mxu1 %v995_v17 }
  0x27   : > { %933 = vmatpush3.bf16.msra.mxu0 %v993_v12  ;;  %v786_v12 = vld [vmem:[%s1126_s4] ss:$0 sm:$0xff] }
  0x28   : > { %934 = vmatprep.subr.bf16.mxu0 %v994_v16 }
  0x2a   : > { %919 = vmatmul.mubr.msk.bf16.gmra.mrb[12].mxu0 %vm308_vm0, %v987_v15 }
  0x2b   : > { %935 = vmatpush3.bf16.msra.mxu0 %v994_v16 }
  0x2c   : > { %936 = vmatprep.subr.bf16.mxu0 %v995_v17 }
  0x2f   : > { %937 = vmatpush3.bf16.msra.mxu0 %v995_v17 }
  0xe5   : > { %v908_v19 = vpop.f32.mrb[0].mxu0 }
  0xe6   : > { %v376_v20 = vadd.f32 %v908_v19, %v767_v18  ;;  %v367_v21 = vpop.f32.mrb[1].mxu0 }
  0xe7   : > { %v368_v22 = vadd.f32 %v767_v18, %v367_v21  ;;  %v909_v23 = vpop.f32.mrb[2].mxu0 }
  0xe8   : > { %v379_v24 = vadd.f32 %v909_v23, %v767_v18  ;;  %v370_v25 = vpop.f32.mrb[3].mxu0  ;;  %v432_v27 = vmax.f32 %v376_v20, 0.0 }
  0xe9   : > { %v371_v26 = vadd.f32 %v767_v18, %v370_v25  ;;  %v430_v29 = vmax.f32 %v368_v22, 0.0 }
  0xea   : > { %v433_v28 = vmax.f32 %v379_v24, 0.0 }
  0xeb   : > { %v431_v30 = vmax.f32 %v371_v26, 0.0 }
  0xec   : > { %v447_v31 = vpack.c.bf16 %v433_v28, %v432_v27 }
  0xed   : > { %v446_v32 = vpack.c.bf16 %v431_v30, %v430_v29  ;;  %v912_v33 = vpop.f32.mrb[4].mxu0 }
  0xee   : > { %v392_v34 = vadd.f32 %v912_v33, %v767_v18  ;;  %v383_v35 = vpop.f32.mrb[5].mxu0 }
  0xef   : > { %v384_v36 = vadd.f32 %v767_v18, %v383_v35  ;;  %v913_v37 = vpop.f32.mrb[6].mxu0  ;;  %938 = vmatprep.mubr.bf16.mxu0 %v446_v32 }
  0xf0   : > { %v395_v38 = vadd.f32 %v913_v37, %v767_v18  ;;  %v386_v39 = vpop.f32.mrb[7].mxu0  ;;  %939 = vmatmul.mubr.bf16.vlgmr.msra.gmra.mrb[16].mxu0 %v447_v31  ;;  %v436_v41 = vmax.f32 %v392_v34, 0.0 }
  0xf1   : > { %v387_v40 = vadd.f32 %v767_v18, %v386_v39  ;;  %v434_v43 = vmax.f32 %v384_v36, 0.0 }
  0xf2   : > { %v437_v42 = vmax.f32 %v395_v38, 0.0 }
  0xf3   : > { %v435_v44 = vmax.f32 %v387_v40, 0.0 }
  0xf4   : > { %v449_v45 = vpack.c.bf16 %v437_v42, %v436_v41 }
  0xf5   : > { %v916_v46 = vpop.f32.mrb[8].mxu0  ;;  %v448_v47 = vpack.c.bf16 %v435_v44, %v434_v43 }
  0xf6   : > { %v408_v48 = vadd.f32 %v916_v46, %v767_v18  ;;  %v399_v49 = vpop.f32.mrb[9].mxu0 }
  0xf7   : > { %v400_v50 = vadd.f32 %v767_v18, %v399_v49  ;;  %v917_v51 = vpop.f32.mrb[10].mxu0  ;;  %942 = vmatprep.mubr.bf16.mxu1 %v448_v47 }
  0xf8   : > { %v411_v52 = vadd.f32 %v917_v51, %v767_v18  ;;  %v402_v53 = vpop.f32.mrb[11].mxu0  ;;  %943 = vmatmul.mubr.bf16.vlgmr.msra.gmra.mrb[0].mxu1 %v449_v45  ;;  %v440_v55 = vmax.f32 %v408_v48, 0.0 }
  0xf9   : > { %v403_v54 = vadd.f32 %v767_v18, %v402_v53  ;;  %v438_v57 = vmax.f32 %v400_v50, 0.0 }
  0xfa   : > { %v441_v56 = vmax.f32 %v411_v52, 0.0 }
  0xfb   : > { %v439_v58 = vmax.f32 %v403_v54, 0.0 }
  0xfc   : > { %v451_v59 = vpack.c.bf16 %v441_v56, %v440_v55 }
  0xfd   : > { %v450_v60 = vpack.c.bf16 %v439_v58, %v438_v57  ;;  %v920_v61 = vpop.f32.mrb[12].mxu0 }
  0xfe   : > { %v424_v62 = vadd.f32 %v920_v61, %v767_v18  ;;  %v415_v63 = vpop.f32.mrb[13].mxu0 }
  0xff   : > { %v416_v0 = vadd.f32 %v767_v18, %v415_v63  ;;  %v921_v1 = vpop.f32.mrb[14].mxu0  ;;  %946 = vmatprep.mubr.bf16.mxu1 %v450_v60 }
 0x100   : > { %v427_v2 = vadd.f32 %v921_v1, %v767_v18  ;;  %v418_v3 = vpop.f32.mrb[15].mxu0  ;;  %947 = vmatmul.mubr.bf16.gmra.mrb[4].mxu1 %v451_v59  ;;  %v444_v5 = vmax.f32 %v424_v62, 0.0 }
 0x101   : > { %v419_v4 = vadd.f32 %v767_v18, %v418_v3  ;;  %v442_v7 = vmax.f32 %v416_v0, 0.0 }
 0x102   : > { %v445_v6 = vmax.f32 %v427_v2, 0.0 }
 0x103   : > { %v443_v8 = vmax.f32 %v419_v4, 0.0 }
 0x104   : > { %v453_v9 = vpack.c.bf16 %v445_v6, %v444_v5 }
 0x105   : > { %v452_v10 = vpack.c.bf16 %v443_v8, %v442_v7 }
 0x107   : > { %950 = vmatprep.mubr.bf16.mxu1 %v452_v10 }
 0x108   : > { %951 = vmatmul.mubr.bf16.gmra.mrb[8].mxu1 %v453_v9 }
 0x1c3   : > { %v940_v11 = vpop.f32.mrb[16].mxu0 }
 0x1c4   : > { %v559_v13 = vpop.f32.mrb[17].mxu0  ;;  %v568_v15 = vadd.f32 %v940_v11, %v786_v12 }
 0x1c5   : > { %v941_v14 = vpop.f32.mrb[18].mxu0  ;;  %v560_v18 = vadd.f32 %v786_v12, %v559_v13 }
 0x1c6   : > { %v571_v16 = vadd.f32 %v941_v14, %v786_v12  ;;  %v562_v17 = vpop.f32.mrb[19].mxu0 }
 0x1c7   : > { %v563_v19 = vadd.f32 %v786_v12, %v562_v17 }
 0x1c8   : > { %v837_v20 = vpack.c.bf16 %v571_v16, %v568_v15 }
 0x1c9   : > { %v832_v21 = vpack.c.bf16 %v563_v19, %v560_v18 }
 0x1ca   : > { %869 = vst [vmem:[%s1109_s28 + $0x8] sm:$0xff] %v837_v20  }
 0x1cb   : > { %833 = vst [vmem:[%s1109_s28] sm:$0xff] %v832_v21   ;;  %v944_v22 = vpop.f32.mrb[0].mxu1 }
 0x1cc   : > { %v575_v23 = vpop.f32.mrb[1].mxu1  ;;  %v584_v25 = vadd.f32 %v944_v22, %v786_v12 }
 0x1cd   : > { %v945_v24 = vpop.f32.mrb[2].mxu1  ;;  %v576_v28 = vadd.f32 %v786_v12, %v575_v23 }
 0x1ce   : > { %v587_v26 = vadd.f32 %v945_v24, %v786_v12  ;;  %v578_v27 = vpop.f32.mrb[3].mxu1 }
 0x1cf   : > { %v579_v29 = vadd.f32 %v786_v12, %v578_v27 }
 0x1d0   : > { %v847_v30 = vpack.c.bf16 %v587_v26, %v584_v25 }
 0x1d1   : > { %v842_v31 = vpack.c.bf16 %v579_v29, %v576_v28 }
 0x1d2   : > { %871 = vst [vmem:[%s1109_s28 + $0x18] sm:$0xff] %v847_v30  }
 0x1d3   : > { %870 = vst [vmem:[%s1109_s28 + $0x10] sm:$0xff] %v842_v31   ;;  %v948_v32 = vpop.f32.mrb[4].mxu1 }
 0x1d4   : > { %v591_v33 = vpop.f32.mrb[5].mxu1  ;;  %v600_v35 = vadd.f32 %v948_v32, %v786_v12 }
 0x1d5   : > { %v949_v34 = vpop.f32.mrb[6].mxu1  ;;  %v592_v38 = vadd.f32 %v786_v12, %v591_v33 }
 0x1d6   : > { %v603_v36 = vadd.f32 %v949_v34, %v786_v12  ;;  %v594_v37 = vpop.f32.mrb[7].mxu1 }
 0x1d7   : > { %v595_v39 = vadd.f32 %v786_v12, %v594_v37 }
 0x1d8   : > { %v857_v40 = vpack.c.bf16 %v603_v36, %v600_v35 }
 0x1d9   : > { %v852_v41 = vpack.c.bf16 %v595_v39, %v592_v38 }
 0x1da   : > { %873 = vst [vmem:[%s1109_s28 + $0x28] sm:$0xff] %v857_v40  }
 0x1db   : > { %872 = vst [vmem:[%s1109_s28 + $0x20] sm:$0xff] %v852_v41   ;;  %v952_v42 = vpop.f32.mrb[8].mxu1 }
 0x1dc   : > { %v607_v43 = vpop.f32.mrb[9].mxu1  ;;  %v616_v45 = vadd.f32 %v952_v42, %v786_v12 }
 0x1dd   : > { %v953_v44 = vpop.f32.mrb[10].mxu1  ;;  %v608_v48 = vadd.f32 %v786_v12, %v607_v43 }
 0x1de   : > { %v619_v46 = vadd.f32 %v953_v44, %v786_v12  ;;  %v610_v47 = vpop.f32.mrb[11].mxu1 }
 0x1df   : > { %v611_v49 = vadd.f32 %v786_v12, %v610_v47 }
 0x1e0   : > { %v867_v50 = vpack.c.bf16 %v619_v46, %v616_v45 }
 0x1e1   : > { %v862_v51 = vpack.c.bf16 %v611_v49, %v608_v48 }
 0x1e2   : > { %875 = vst [vmem:[%s1109_s28 + $0x38] sm:$0xff] %v867_v50  }
 0x1e3   : > { %874 = vst [vmem:[%s1109_s28 + $0x30] sm:$0xff] %v862_v51  }
 0x1e4 PF: > { %s15_s18 = sadd.s32 1, %s1002_s18  }
 0x1e5   : > { %p12_p4 = scmp.ge.s32.totalorder %s15_s18, 4  }
 0x1e7   :  { %14 = sbr.rel (!%p12_p4) target bundleno = 1 (0x1), region = 70 }

</bundles_post_ra>
